<compile_context>
chip_gen: v7x
topology: tpu7x:2x2x1
jax: 0.10.0
libtpu: 0.0.40
codegen_flags: <defaults>
</compile_context>

<pallas_src>
import functools

import jax
import jax.numpy as jnp
from jax.experimental import pallas as pl
from jax.experimental.pallas import tpu as pltpu

DIMS = (16, 32, 64, 32, 10)


def _round_up(x, m):
    return (x + m - 1) // m * m


def mlp_kernel(x_ref,
               w1_ref, b1_ref,
               w2_ref, b2_ref,
               w3_ref, b3_ref,
               w4_ref, b4_ref,
               o_ref):
    # x arrives as f32; narrow to the matmul dtype in-kernel (cheap VPU cast hidden
    # under the pipeline). Every dot accumulates into f32 via preferred_element_type,
    # so bias add + ReLU run on the f32 VPU path; only the MXU operands are narrow.
    mm_dtype = w1_ref.dtype
    x = x_ref[...].astype(mm_dtype)

    h = jnp.dot(x, w1_ref[...], preferred_element_type=jnp.float32) + b1_ref[...]
    h = jnp.maximum(h, 0.0)

    h = jnp.dot(h.astype(mm_dtype), w2_ref[...], preferred_element_type=jnp.float32) + b2_ref[...]
    h = jnp.maximum(h, 0.0)

    h = jnp.dot(h.astype(mm_dtype), w3_ref[...], preferred_element_type=jnp.float32) + b3_ref[...]
    h = jnp.maximum(h, 0.0)

    out = jnp.dot(h.astype(mm_dtype), w4_ref[...], preferred_element_type=jnp.float32) + b4_ref[...]
    # Narrow (10-wide) store: masked vst is cheaper than 12.8x extra write bytes since
    # this kernel is DMA-bound, not store-slot bound.
    o_ref[...] = out.astype(o_ref.dtype)


@functools.partial(jax.jit, static_argnames=("tile_b", "matmul_dtype"))
def neural_network_forward(x, params, *, tile_b=2048, matmul_dtype=jnp.bfloat16):
    """x: [batch, 16] float32. params: w1..w4 ([in, out]) and b1..b4 ([1, out])."""
    batch, in_dim = x.shape
    out_dim = params["w4"].shape[1]

    # Batch tile: multiple of 8, no larger than the (padded) batch.
    tile_b = min(tile_b, _round_up(batch, 8))
    tile_b = max(8, _round_up(tile_b, 8))
    # Keep >= 4 grid steps when the batch allows it, so v7x's two TensorCores both get
    # work (parallel grid axis) and the double-buffered pipeline can actually fill.
    if batch >= 32 and _round_up(batch, tile_b) // tile_b < 4:
        tile_b = max(8, _round_up(pl.cdiv(batch, 4), 8))
    padded_batch = _round_up(batch, tile_b)
    num_tiles = padded_batch // tile_b

    # x stays f32 here (cast happens in-kernel); only pad the batch if needed.
    x_in = x
    if padded_batch != batch:
        x_in = jnp.pad(x_in, ((0, padded_batch - batch), (0, 0)))

    weights = (params["w1"].astype(matmul_dtype), params["b1"].astype(jnp.float32),
               params["w2"].astype(matmul_dtype), params["b2"].astype(jnp.float32),
               params["w3"].astype(matmul_dtype), params["b3"].astype(jnp.float32),
               params["w4"].astype(matmul_dtype), params["b4"].astype(jnp.float32))

    # Weights/biases: full-extent blocks with a constant index_map -> VMEM-resident
    # across all grid steps.
    def resident(a):
        return pl.BlockSpec(a.shape, lambda i: (0,) * a.ndim)

    # x / out tiles are pipelined over the batch grid; default double-buffering is
    # plenty now that the per-tile transfers are 64 B/row (x, f32) + 40 B/row (out).
    x_spec = pl.BlockSpec((tile_b, in_dim), lambda i: (i, 0))
    out_spec = pl.BlockSpec((tile_b, out_dim), lambda i: (i, 0))

    # Advisory cost estimate: this call is HBM-bound; help XLA overlap neighbors.
    flops = 2 * padded_batch * sum(a * b for a, b in zip(DIMS[:-1], DIMS[1:]))
    bytes_accessed = (padded_batch * in_dim * x_in.dtype.itemsize
                      + padded_batch * out_dim * 4
                      + sum(int(a.size) * a.dtype.itemsize for a in weights))
    cost = pl.CostEstimate(flops=flops, transcendentals=0,
                           bytes_accessed=bytes_accessed)

    out = pl.pallas_call(
        mlp_kernel,
        out_shape=jax.ShapeDtypeStruct((padded_batch, out_dim), jnp.float32),
        grid_spec=pltpu.PrefetchScalarGridSpec(
            num_scalar_prefetch=0,
            grid=(num_tiles,),
            in_specs=[x_spec] + [resident(a) for a in weights],
            out_specs=out_spec,
        ),
        compiler_params=pltpu.CompilerParams(
            # Batch tiles are independent -> shard across v7x's two TensorCores.
            dimension_semantics=("parallel",),
        ),
        cost_estimate=cost,
    )(x_in, *weights)

    # Only trims batch padding; a no-op when batch is already tile-aligned.
    return out[:batch]


def init_params(key):
    """Deterministic init mimicking nn.Linear's U(-1/sqrt(fan_in), 1/sqrt(fan_in))."""
    params = {}
    for i, (fan_in, fan_out) in enumerate(zip(DIMS[:-1], DIMS[1:]), start=1):
        key, kw, kb = jax.random.split(key, 3)
        bound = 1.0 / (fan_in ** 0.5)
        params[f"w{i}"] = jax.random.uniform(
            kw, (fan_in, fan_out), jnp.float32, minval=-bound, maxval=bound)
        params[f"b{i}"] = jax.random.uniform(
            kb, (1, fan_out), jnp.float32, minval=-bound, maxval=bound)
    return params


def reference_forward(x, params, matmul_dtype=jnp.bfloat16):
    """Pure-JAX reference with the same operand precision as the kernel."""
    h = x.astype(matmul_dtype)
    for i in (1, 2, 3):
        h = jnp.dot(h, params[f"w{i}"].astype(matmul_dtype),
                    preferred_element_type=jnp.float32) + params[f"b{i}"]
        h = jnp.maximum(h, 0.0).astype(matmul_dtype)
    return jnp.dot(h, params["w4"].astype(matmul_dtype),
                   preferred_element_type=jnp.float32) + params["b4"]


if __name__ == "__main__":
    key = jax.random.PRNGKey(0)
    key, kx = jax.random.split(key)

    batch = 256
    x = jax.random.normal(kx, (batch, 16), jnp.float32)
    params = init_params(key)

    # batch=256 -> tile shrinks to 64 -> 4 grid steps: exercises the pipelined /
    # parallel batch grid.
    out = jax.block_until_ready(neural_network_forward(x, params))
    assert out.shape == (batch, 10), out.shape

    ref = reference_forward(x, params)
    assert jnp.allclose(out, ref, atol=2e-3, rtol=2e-3), "mismatch vs reference"

    # Ragged batch (not a multiple of 8 / the tile): exercises pad + trim path.
    x2 = x[:50]
    out2 = jax.block_until_ready(neural_network_forward(x2, params))
    assert out2.shape == (50, 10), out2.shape
    assert jnp.allclose(out2, ref[:50], atol=2e-3, rtol=2e-3), "ragged mismatch"

    print("KERNEL_OK")
</pallas_src>

<mosaic_0001>
module attributes {stable_mosaic.version = 11 : i64} {
  func.func @mlp_kernel(%arg0: i32, %arg1: memref<64x16xf32, #tpu.memory_space<vmem>>, %arg2: memref<16x32xbf16, #tpu.memory_space<vmem>>, %arg3: memref<1x32xf32, #tpu.memory_space<vmem>>, %arg4: memref<32x64xbf16, #tpu.memory_space<vmem>>, %arg5: memref<1x64xf32, #tpu.memory_space<vmem>>, %arg6: memref<64x32xbf16, #tpu.memory_space<vmem>>, %arg7: memref<1x32xf32, #tpu.memory_space<vmem>>, %arg8: memref<32x10xbf16, #tpu.memory_space<vmem>>, %arg9: memref<1x10xf32, #tpu.memory_space<vmem>>, %arg10: memref<64x10xf32, #tpu.memory_space<vmem>>) attributes {dimension_semantics = [#tpu.dimension_semantics<parallel>], iteration_bounds = array<i64: 4>, scalar_prefetch = 0 : i64, scratch_operands = 0 : i64, tpu.core_type = #tpu.core_type<tc>, window_params = [{transform_indices = @transform_0, window_bounds = array<i64: 64, 16>}, {pipeline_mode = #tpu.pipeline_mode<synchronous>, transform_indices = @transform_1, window_bounds = array<i64: 16, 32>}, {pipeline_mode = #tpu.pipeline_mode<synchronous>, transform_indices = @transform_2, window_bounds = array<i64: 1, 32>}, {pipeline_mode = #tpu.pipeline_mode<synchronous>, transform_indices = @transform_3, window_bounds = array<i64: 32, 64>}, {pipeline_mode = #tpu.pipeline_mode<synchronous>, transform_indices = @transform_4, window_bounds = array<i64: 1, 64>}, {pipeline_mode = #tpu.pipeline_mode<synchronous>, transform_indices = @transform_5, window_bounds = array<i64: 64, 32>}, {pipeline_mode = #tpu.pipeline_mode<synchronous>, transform_indices = @transform_6, window_bounds = array<i64: 1, 32>}, {pipeline_mode = #tpu.pipeline_mode<synchronous>, transform_indices = @transform_7, window_bounds = array<i64: 32, 10>}, {pipeline_mode = #tpu.pipeline_mode<synchronous>, transform_indices = @transform_8, window_bounds = array<i64: 1, 10>}, {transform_indices = @transform_9, window_bounds = array<i64: 64, 10>}]} {
    %c0 = arith.constant 0 : index
    %c0_0 = arith.constant 0 : index
    %0 = vector.load %arg1[%c0, %c0_0] : memref<64x16xf32, #tpu.memory_space<vmem>>, vector<64x16xf32>
    %1 = arith.truncf %0 : vector<64x16xf32> to vector<64x16xbf16>
    %c0_1 = arith.constant 0 : index
    %c0_2 = arith.constant 0 : index
    %2 = vector.load %arg2[%c0_1, %c0_2] : memref<16x32xbf16, #tpu.memory_space<vmem>>, vector<16x32xbf16>
    %cst = arith.constant dense<0.000000e+00> : vector<64x32xf32>
    %3 = tpu.matmul %1, %2, %cst {dimension_numbers = #tpu.dot_dimension_numbers<[1], [0], [0], [1], [0, 0, 1, 1], [], []>} : vector<64x16xbf16>, vector<16x32xbf16>, vector<64x32xf32> -> vector<64x32xf32>
    %c0_3 = arith.constant 0 : index
    %c0_4 = arith.constant 0 : index
    %4 = vector.load %arg3[%c0_3, %c0_4] : memref<1x32xf32, #tpu.memory_space<vmem>>, vector<1x32xf32>
    %5 = vector.broadcast %4 : vector<1x32xf32> to vector<64x32xf32>
    %6 = arith.addf %3, %5 : vector<64x32xf32>
    %cst_5 = arith.constant 0.000000e+00 : f32
    %7 = vector.broadcast %cst_5 : f32 to vector<64x32xf32>
    %8 = arith.maximumf %6, %7 : vector<64x32xf32>
    %9 = arith.truncf %8 : vector<64x32xf32> to vector<64x32xbf16>
    %c0_6 = arith.constant 0 : index
    %c0_7 = arith.constant 0 : index
    %10 = vector.load %arg4[%c0_6, %c0_7] : memref<32x64xbf16, #tpu.memory_space<vmem>>, vector<32x64xbf16>
    %cst_8 = arith.constant dense<0.000000e+00> : vector<64x64xf32>
    %11 = tpu.matmul %9, %10, %cst_8 {dimension_numbers = #tpu.dot_dimension_numbers<[1], [0], [0], [1], [0, 0, 1, 1], [], []>} : vector<64x32xbf16>, vector<32x64xbf16>, vector<64x64xf32> -> vector<64x64xf32>
    %c0_9 = arith.constant 0 : index
    %c0_10 = arith.constant 0 : index
    %12 = vector.load %arg5[%c0_9, %c0_10] : memref<1x64xf32, #tpu.memory_space<vmem>>, vector<1x64xf32>
    %13 = vector.broadcast %12 : vector<1x64xf32> to vector<64x64xf32>
    %14 = arith.addf %11, %13 : vector<64x64xf32>
    %cst_11 = arith.constant 0.000000e+00 : f32
    %15 = vector.broadcast %cst_11 : f32 to vector<64x64xf32>
    %16 = arith.maximumf %14, %15 : vector<64x64xf32>
    %17 = arith.truncf %16 : vector<64x64xf32> to vector<64x64xbf16>
    %c0_12 = arith.constant 0 : index
    %c0_13 = arith.constant 0 : index
    %18 = vector.load %arg6[%c0_12, %c0_13] : memref<64x32xbf16, #tpu.memory_space<vmem>>, vector<64x32xbf16>
    %cst_14 = arith.constant dense<0.000000e+00> : vector<64x32xf32>
    %19 = tpu.matmul %17, %18, %cst_14 {dimension_numbers = #tpu.dot_dimension_numbers<[1], [0], [0], [1], [0, 0, 1, 1], [], []>} : vector<64x64xbf16>, vector<64x32xbf16>, vector<64x32xf32> -> vector<64x32xf32>
    %c0_15 = arith.constant 0 : index
    %c0_16 = arith.constant 0 : index
    %20 = vector.load %arg7[%c0_15, %c0_16] : memref<1x32xf32, #tpu.memory_space<vmem>>, vector<1x32xf32>
    %21 = vector.broadcast %20 : vector<1x32xf32> to vector<64x32xf32>
    %22 = arith.addf %19, %21 : vector<64x32xf32>
    %cst_17 = arith.constant 0.000000e+00 : f32
    %23 = vector.broadcast %cst_17 : f32 to vector<64x32xf32>
    %24 = arith.maximumf %22, %23 : vector<64x32xf32>
    %25 = arith.truncf %24 : vector<64x32xf32> to vector<64x32xbf16>
    %c0_18 = arith.constant 0 : index
    %c0_19 = arith.constant 0 : index
    %26 = vector.load %arg8[%c0_18, %c0_19] : memref<32x10xbf16, #tpu.memory_space<vmem>>, vector<32x10xbf16>
    %cst_20 = arith.constant dense<0.000000e+00> : vector<64x10xf32>
    %27 = tpu.matmul %25, %26, %cst_20 {dimension_numbers = #tpu.dot_dimension_numbers<[1], [0], [0], [1], [0, 0, 1, 1], [], []>} : vector<64x32xbf16>, vector<32x10xbf16>, vector<64x10xf32> -> vector<64x10xf32>
    %c0_21 = arith.constant 0 : index
    %c0_22 = arith.constant 0 : index
    %28 = vector.load %arg9[%c0_21, %c0_22] : memref<1x10xf32, #tpu.memory_space<vmem>>, vector<1x10xf32>
    %29 = vector.broadcast %28 : vector<1x10xf32> to vector<64x10xf32>
    %30 = arith.addf %27, %29 : vector<64x10xf32>
    %c0_23 = arith.constant 0 : index
    %c0_24 = arith.constant 0 : index
    %31 = vector.load %arg10[%c0_23, %c0_24] : memref<64x10xf32, #tpu.memory_space<vmem>>, vector<64x10xf32>
    tpu.vector_store %arg10[%c0_23, %c0_24], %30 {strides = array<i32>} : memref<64x10xf32, #tpu.memory_space<vmem>>, vector<64x10xf32>,
    return
  }
  func.func @transform_0(%arg0: i32) -> (i32, i32) {
    %c0_i32 = arith.constant 0 : i32
    %c0_i32_0 = arith.constant 0 : i32
    return %arg0, %c0_i32 : i32, i32
  }
  func.func @transform_1(%arg0: i32) -> (i32, i32) {
    %c0_i32 = arith.constant 0 : i32
    %c0_i32_0 = arith.constant 0 : i32
    %c0_i32_1 = arith.constant 0 : i32
    return %c0_i32, %c0_i32_0 : i32, i32
  }
  func.func @transform_2(%arg0: i32) -> (i32, i32) {
    %c0_i32 = arith.constant 0 : i32
    %c0_i32_0 = arith.constant 0 : i32
    %c0_i32_1 = arith.constant 0 : i32
    return %c0_i32, %c0_i32_0 : i32, i32
  }
  func.func @transform_3(%arg0: i32) -> (i32, i32) {
    %c0_i32 = arith.constant 0 : i32
    %c0_i32_0 = arith.constant 0 : i32
    %c0_i32_1 = arith.constant 0 : i32
    return %c0_i32, %c0_i32_0 : i32, i32
  }
  func.func @transform_4(%arg0: i32) -> (i32, i32) {
    %c0_i32 = arith.constant 0 : i32
    %c0_i32_0 = arith.constant 0 : i32
    %c0_i32_1 = arith.constant 0 : i32
    return %c0_i32, %c0_i32_0 : i32, i32
  }
  func.func @transform_5(%arg0: i32) -> (i32, i32) {
    %c0_i32 = arith.constant 0 : i32
    %c0_i32_0 = arith.constant 0 : i32
    %c0_i32_1 = arith.constant 0 : i32
    return %c0_i32, %c0_i32_0 : i32, i32
  }
  func.func @transform_6(%arg0: i32) -> (i32, i32) {
    %c0_i32 = arith.constant 0 : i32
    %c0_i32_0 = arith.constant 0 : i32
    %c0_i32_1 = arith.constant 0 : i32
    return %c0_i32, %c0_i32_0 : i32, i32
  }
  func.func @transform_7(%arg0: i32) -> (i32, i32) {
    %c0_i32 = arith.constant 0 : i32
    %c0_i32_0 = arith.constant 0 : i32
    %c0_i32_1 = arith.constant 0 : i32
    return %c0_i32, %c0_i32_0 : i32, i32
  }
  func.func @transform_8(%arg0: i32) -> (i32, i32) {
    %c0_i32 = arith.constant 0 : i32
    %c0_i32_0 = arith.constant 0 : i32
    %c0_i32_1 = arith.constant 0 : i32
    return %c0_i32, %c0_i32_0 : i32, i32
  }
  func.func @transform_9(%arg0: i32) -> (i32, i32) {
    %c0_i32 = arith.constant 0 : i32
    %c0_i32_0 = arith.constant 0 : i32
    return %arg0, %c0_i32 : i32, i32
  }
}

</mosaic_0001>

<bundles_post_ra>
// kernel: neural_network_forward.1
= control target key start
LH: loop header
LB: loop body
LE: loop exit
PB: predicated region body
PF: predicated region fallthrough
CT: control target
= control target key end

     0   :  { %s1051_s30 = smov 0   ;;  %s1134_s0 = inlined_call_operand.vmem [shape: f32[256,16], index: 0, kind: input, shape index: {}]   ;;  %s1135_s1 = inlined_call_operand.vmem [shape: bf16[16,32], index: 1, kind: input, shape index: {}]   ;;  %s1136_s2 = inlined_call_operand.vmem [shape: f32[1,32], index: 2, kind: input, shape index: {}]   ;;  %s1137_s3 = inlined_call_operand.vmem [shape: bf16[32,64], index: 3, kind: input, shape index: {}]   ;;  %s1138_s4 = inlined_call_operand.vmem [shape: f32[1,64], index: 4, kind: input, shape index: {}]   ;;  %s1139_s5 = inlined_call_operand.vmem [shape: bf16[64,32], index: 5, kind: input, shape index: {}]   ;;  %s1140_s6 = inlined_call_operand.vmem [shape: f32[1,32], index: 6, kind: input, shape index: {}]   ;;  %s1141_s7 = inlined_call_operand.vmem [shape: bf16[32,10], index: 7, kind: input, shape index: {}]   ;;  %s1142_s8 = inlined_call_operand.vmem [shape: f32[1,10], index: 8, kind: input, shape index: {}]   ;;  %s1143_s9 = inlined_call_operand.vmem [shape: f32[256,10], index: 9, kind: output, shape index: {}]  }
   0x1 LB: > { %s861_s10 = sadd.s32 4294967295, %s999_s30   ;;  %p865_p0 = scmp.ge.s32.totalorder %s999_s30, 1  ;;  %s999_s30 = sphi %s1051_s30, %s19_s30  }
   0x2   : > { %p288_p1 = scmp.lt.s32.totalorder %s999_s30, 5 }
   0x4   : > { %p289_p2 = pnand %p865_p0, %p288_p1 }
   0x5   : > { %v984_v0 = vld [vmem:[%s1135_s1] sm:$0xff] (!%p289_p2)   ;;  %s866_s13 = sshll.u32 (!%p289_p2), %s861_s10, 3  ;;  %vm364_vm0 = vcmask (!%p289_p2), 130048   ;;  %v986_v14 = vld [vmem:[%s1137_s3 + $0x8] sm:$0xff] (!%p289_p2)   ;;  %vm477_vm1 = vcmask (!%p289_p2), 261120   ;;  %v989_v46 = vld [vmem:[%s1139_s5 + $0x10] sm:$0xff] (!%p289_p2)  }
   0x6   : > { %292 = sbr.rel (%p289_p2) target bundleno = 912 (0x390), region = 56  ;;  %p325_p3 = scmp.lt.s32.totalorder (!%p289_p2), %s866_s13, 31  ;;  %926 = vmatprep.subr.bf16.mxu0 (!%p289_p2), %v984_v0  ;;  %v985_v13 = vld [vmem:[%s1137_s3] sm:$0xff] (!%p289_p2)   ;;  %v988_v16 = vld [vmem:[%s1139_s5 + $0x8] sm:$0xff] (!%p289_p2)   ;;  %v990_v47 = vld [vmem:[%s1139_s5 + $0x18] sm:$0xff] (!%p289_p2)   ;;  %vm606_vm2 = vcmask (!%p289_p2), 523264  }
   0x7   : > { %927 = vmatpush3.bf16.msra.mxu0 (!%p289_p2), %v984_v0  ;;  %936 = vmatprep.subr.bf16.mxu1 (!%p289_p2), %v985_v13  ;;  %v987_v15 = vld [vmem:[%s1139_s5] sm:$0xff] (!%p289_p2)   ;;  %vm796_vm3 = vcmask (!%p289_p2), 80896  }
   0x8   : > { %937 = vmatpush3.bf16.msra.mxu1 (!%p289_p2), %v985_v13  ;;  %948 = vmatprep.subr.bf16.mxu0 (!%p289_p2), %v987_v15  ;;  %v870_v17 = vld [vmem:[%s1136_s2] ss:$0 sm:$0xff] (!%p289_p2) }
   0x9   : > { %938 = vmatprep.subr.bf16.mxu1 (!%p289_p2), %v986_v14  ;;  %v991_v48 = vld [vmem:[%s1141_s7] sm:$0xff] (!%p289_p2)  }
   0xa   : > { %v876_v49 = vld [vmem:[%s1138_s4] ss:$0 sm:$0xff] (!%p289_p2) }
   0xc   : > { %939 = vmatpush3.bf16.msra.mxu1 (!%p289_p2), %v986_v14  ;;  %v992_v14 = vld [vmem:[%s1141_s7 + $0x8] sm:$0xff] (!%p289_p2)  }
   0xd   : > { %s1145_s13 = smov (!%p325_p3, %s866_s13), 31  ;;  %964 = vmatprep.subr.bf16.mxu1 %v991_v48 }
   0xe   : > { %s867_s14 = sshll.u32 %s1145_s13, 3 }
   0xf   : > { %s328_s17 = scalar_lea.vmem %s1134_s0, %s867_s14  ;;  %s334_s26 = scalar_lea.vmem %s1143_s9, %s867_s14 }
  0x10   : > { %v337_v1 = vld [vmem:[%s328_s17] sm:$0xff]  ;;  %v338_v2 = vld [vmem:[%s328_s17 + $0x8] sm:$0xff]  ;;  %v339_v3 = vld [vmem:[%s328_s17 + $0x10] sm:$0xff] }
  0x11   : > { %v345_v4 = vpack.c.bf16 %v338_v2, %v337_v1  ;;  %v340_v5 = vld [vmem:[%s328_s17 + $0x18] sm:$0xff]  ;;  %v341_v6 = vld [vmem:[%s328_s17 + $0x20] sm:$0xff]  ;;  %v342_v7 = vld [vmem:[%s328_s17 + $0x28] sm:$0xff] }
  0x12   : > { %v346_v8 = vpack.c.bf16 %v340_v5, %v339_v3  ;;  %v347_v9 = vpack.c.bf16 %v342_v7, %v341_v6  ;;  %v343_v10 = vld [vmem:[%s328_s17 + $0x30] sm:$0xff]  ;;  %v344_v11 = vld [vmem:[%s328_s17 + $0x38] sm:$0xff] }
  0x13   : > { %928 = vmatprep.mubr.msk.bf16.mxu0 %vm364_vm0, %v345_v4  ;;  %v348_v12 = vpack.c.bf16 %v344_v11, %v343_v10 }
  0x14   : > { %929 = vmatmul.mubr.msk.bf16.vlgmr.msra.gmra.mrb[0].mxu0 %vm364_vm0, %v346_v8 }
  0x15   : > { %932 = vmatprep.mubr.msk.bf16.mxu0 %vm364_vm0, %v347_v9  ;;  %949 = vmatpush3.bf16.msra.mxu0 %v987_v15  ;;  %v883_v15 = vld [vmem:[%s1140_s6] ss:$0 sm:$0xff] }
  0x16   : > { %950 = vmatprep.subr.bf16.mxu0 %v988_v16 }
  0x19   : > { %951 = vmatpush3.bf16.msra.mxu0 %v988_v16 }
  0x1a   : > { %952 = vmatprep.subr.bf16.mxu0 %v989_v46 }
  0x1c   : > { %933 = vmatmul.mubr.msk.bf16.gmra.mrb[4].mxu0 %vm364_vm0, %v348_v12 }
  0x1d   : > { %953 = vmatpush3.bf16.msra.mxu0 %v989_v46 }
  0x1e   : > { %954 = vmatprep.subr.bf16.mxu0 %v990_v47 }
  0x21   : > { %955 = vmatpush3.bf16.msra.mxu0 %v990_v47 }
  0xe7   : > { %v930_v18 = vpop.f32.mrb[0].mxu0 }
  0xe8   : > { %v420_v19 = vadd.f32 %v930_v18, %v870_v17  ;;  %v411_v20 = vpop.f32.mrb[1].mxu0 }
  0xe9   : > { %v412_v21 = vadd.f32 %v870_v17, %v411_v20  ;;  %v931_v22 = vpop.f32.mrb[2].mxu0 }
  0xea   : > { %v423_v23 = vadd.f32 %v931_v22, %v870_v17  ;;  %v414_v24 = vpop.f32.mrb[3].mxu0  ;;  %v444_v26 = vmax.f32 %v420_v19, 0.0 }
  0xeb   : > { %v415_v25 = vadd.f32 %v870_v17, %v414_v24  ;;  %v442_v28 = vmax.f32 %v412_v21, 0.0 }
  0xec   : > { %v445_v27 = vmax.f32 %v423_v23, 0.0 }
  0xed   : > { %v443_v29 = vmax.f32 %v415_v25, 0.0 }
  0xee   : > { %v451_v30 = vpack.c.bf16 %v445_v27, %v444_v26 }
  0xef   : > { %v934_v31 = vpop.f32.mrb[4].mxu0  ;;  %v450_v32 = vpack.c.bf16 %v443_v29, %v442_v28 }
  0xf0   : > { %v436_v33 = vadd.f32 %v934_v31, %v870_v17  ;;  %v427_v34 = vpop.f32.mrb[5].mxu0 }
  0xf1   : > { %v428_v35 = vadd.f32 %v870_v17, %v427_v34  ;;  %v935_v36 = vpop.f32.mrb[6].mxu0  ;;  %940 = vmatprep.mubr.msk.bf16.mxu1 %vm477_vm1, %v450_v32 }
  0xf2   : > { %v439_v37 = vadd.f32 %v935_v36, %v870_v17  ;;  %v430_v38 = vpop.f32.mrb[7].mxu0  ;;  %941 = vmatmul.mubr.msk.bf16.vlgmr.msra.gmra.mrb[0].mxu1 %vm477_vm1, %v451_v30  ;;  %v448_v40 = vmax.f32 %v436_v33, 0.0 }
  0xf3   : > { %v431_v39 = vadd.f32 %v870_v17, %v430_v38  ;;  %v446_v42 = vmax.f32 %v428_v35, 0.0  ;;  %965 = vmatpush3.bf16.msra.mxu1 %v991_v48 }
  0xf4   : > { %v449_v41 = vmax.f32 %v439_v37, 0.0  ;;  %966 = vmatprep.subr.bf16.mxu1 %v992_v14 }
  0xf5   : > { %v447_v43 = vmax.f32 %v431_v39, 0.0 }
  0xf6   : > { %v453_v44 = vpack.c.bf16 %v449_v41, %v448_v40 }
  0xf7   : > { %v452_v45 = vpack.c.bf16 %v447_v43, %v446_v42  ;;  %967 = vmatpush3.bf16.msra.mxu1 %v992_v14 }
  0xf9   : > { %944 = vmatprep.mubr.msk.bf16.mxu1 %vm477_vm1, %v452_v45 }
  0xfa   : > { %945 = vmatmul.mubr.msk.bf16.gmra.mrb[4].mxu1 %vm477_vm1, %v453_v44  ;;  %v892_v44 = vld [vmem:[%s1142_s8] ss:$0 sm:$0xff] }
 0x1c5   : > { %v942_v50 = vpop.f32.mrb[0].mxu1 }
 0x1c6   : > { %v533_v51 = vadd.f32 %v942_v50, %v876_v49  ;;  %v524_v52 = vpop.f32.mrb[1].mxu1 }
 0x1c7   : > { %v525_v53 = vadd.f32 %v876_v49, %v524_v52  ;;  %v943_v54 = vpop.f32.mrb[2].mxu1 }
 0x1c8   : > { %v536_v55 = vadd.f32 %v943_v54, %v876_v49  ;;  %v527_v56 = vpop.f32.mrb[3].mxu1  ;;  %v557_v58 = vmax.f32 %v533_v51, 0.0 }
 0x1c9   : > { %v528_v57 = vadd.f32 %v876_v49, %v527_v56  ;;  %v555_v60 = vmax.f32 %v525_v53, 0.0 }
 0x1ca   : > { %v558_v59 = vmax.f32 %v536_v55, 0.0 }
 0x1cb   : > { %v556_v61 = vmax.f32 %v528_v57, 0.0 }
 0x1cc   : > { %v564_v62 = vpack.c.bf16 %v558_v59, %v557_v58 }
 0x1cd   : > { %v563_v63 = vpack.c.bf16 %v556_v61, %v555_v60  ;;  %v946_v0 = vpop.f32.mrb[4].mxu1 }
 0x1ce   : > { %v549_v1 = vadd.f32 %v946_v0, %v876_v49  ;;  %v540_v2 = vpop.f32.mrb[5].mxu1 }
 0x1cf   : > { %v541_v3 = vadd.f32 %v876_v49, %v540_v2  ;;  %v947_v4 = vpop.f32.mrb[6].mxu1  ;;  %956 = vmatprep.mubr.msk.bf16.mxu0 %vm606_vm2, %v563_v63 }
 0x1d0   : > { %v552_v5 = vadd.f32 %v947_v4, %v876_v49  ;;  %v543_v6 = vpop.f32.mrb[7].mxu1  ;;  %957 = vmatmul.mubr.msk.bf16.vlgmr.msra.gmra.mrb[8].mxu0 %vm606_vm2, %v564_v62  ;;  %v561_v8 = vmax.f32 %v549_v1, 0.0 }
 0x1d1   : > { %v544_v7 = vadd.f32 %v876_v49, %v543_v6  ;;  %v559_v10 = vmax.f32 %v541_v3, 0.0 }
 0x1d2   : > { %v562_v9 = vmax.f32 %v552_v5, 0.0 }
 0x1d3   : > { %v560_v11 = vmax.f32 %v544_v7, 0.0 }
 0x1d4   : > { %v566_v12 = vpack.c.bf16 %v562_v9, %v561_v8 }
 0x1d5   : > { %v565_v13 = vpack.c.bf16 %v560_v11, %v559_v10 }
 0x1d7   : > { %960 = vmatprep.mubr.msk.bf16.mxu0 %vm606_vm2, %v565_v13 }
 0x1d8   : > { %961 = vmatmul.mubr.msk.bf16.gmra.mrb[12].mxu0 %vm606_vm2, %v566_v12 }
 0x2a3   : > { %v958_v16 = vpop.f32.mrb[8].mxu0 }
 0x2a4   : > { %v662_v17 = vadd.f32 %v958_v16, %v883_v15  ;;  %v653_v18 = vpop.f32.mrb[9].mxu0 }
 0x2a5   : > { %v654_v19 = vadd.f32 %v883_v15, %v653_v18  ;;  %v959_v20 = vpop.f32.mrb[10].mxu0 }
 0x2a6   : > { %v665_v21 = vadd.f32 %v959_v20, %v883_v15  ;;  %v656_v22 = vpop.f32.mrb[11].mxu0  ;;  %v686_v24 = vmax.f32 %v662_v17, 0.0 }
 0x2a7   : > { %v657_v23 = vadd.f32 %v883_v15, %v656_v22  ;;  %v684_v26 = vmax.f32 %v654_v19, 0.0 }
 0x2a8   : > { %v687_v25 = vmax.f32 %v665_v21, 0.0 }
 0x2a9   : > { %v685_v27 = vmax.f32 %v657_v23, 0.0 }
 0x2aa   : > { %v693_v28 = vpack.c.bf16 %v687_v25, %v686_v24 }
 0x2ab   : > { %v692_v29 = vpack.c.bf16 %v685_v27, %v684_v26  ;;  %v962_v30 = vpop.f32.mrb[12].mxu0 }
 0x2ac   : > { %v678_v31 = vadd.f32 %v962_v30, %v883_v15  ;;  %v669_v32 = vpop.f32.mrb[13].mxu0 }
 0x2ad   : > { %v670_v33 = vadd.f32 %v883_v15, %v669_v32  ;;  %v963_v34 = vpop.f32.mrb[14].mxu0  ;;  %968 = vmatprep.mubr.msk.bf16.mxu1 %vm477_vm1, %v692_v29 }
 0x2ae   : > { %v681_v35 = vadd.f32 %v963_v34, %v883_v15  ;;  %v672_v36 = vpop.f32.mrb[15].mxu0  ;;  %969 = vmatmul.mubr.msk.bf16.vlgmr.msra.gmra.mrb[8].mxu1 %vm477_vm1, %v693_v28  ;;  %v690_v38 = vmax.f32 %v678_v31, 0.0 }
 0x2af   : > { %v673_v37 = vadd.f32 %v883_v15, %v672_v36  ;;  %v688_v40 = vmax.f32 %v670_v33, 0.0 }
 0x2b0   : > { %v691_v39 = vmax.f32 %v681_v35, 0.0 }
 0x2b1   : > { %v689_v41 = vmax.f32 %v673_v37, 0.0 }
 0x2b2   : > { %v695_v42 = vpack.c.bf16 %v691_v39, %v690_v38 }
 0x2b3   : > { %v694_v43 = vpack.c.bf16 %v689_v41, %v688_v40 }
 0x2b5   : > { %972 = vmatprep.mubr.msk.bf16.mxu1 %vm477_vm1, %v694_v43 }
 0x2b6   : > { %973 = vmatmul.mubr.msk.bf16.gmra.mrb[12].mxu1 %vm477_vm1, %v695_v42 }
 0x381   : > { %v970_v45 = vpop.f32.mrb[8].mxu1 }
 0x382   : > { %v774_v46 = vadd.f32 %v970_v45, %v892_v44  ;;  %v765_v47 = vpop.f32.mrb[9].mxu1 }
 0x383   : > { %v766_v48 = vadd.f32 %v892_v44, %v765_v47  ;;  %v971_v49 = vpop.f32.mrb[10].mxu1 }
 0x384   : > { %799 = vst.msk [vmem:[%s334_s26 + $0x10] sm:$0xff] %vm796_vm3, %v774_v46  ;;  %v777_v50 = vadd.f32 %v971_v49, %v892_v44  ;;  %v768_v51 = vpop.f32.mrb[11].mxu1 }
 0x385   : > { %797 = vst.msk [vmem:[%s334_s26] sm:$0xff] %vm796_vm3, %v766_v48  ;;  %v769_v52 = vadd.f32 %v892_v44, %v768_v51 }
 0x386   : > { %800 = vst.msk [vmem:[%s334_s26 + $0x18] sm:$0xff] %vm796_vm3, %v777_v50 }
 0x387   : > { %798 = vst.msk [vmem:[%s334_s26 + $0x8] sm:$0xff] %vm796_vm3, %v769_v52 }
 0x389   : > { %v974_v53 = vpop.f32.mrb[12].mxu1 }
 0x38a   : > { %v790_v54 = vadd.f32 %v974_v53, %v892_v44  ;;  %v781_v55 = vpop.f32.mrb[13].mxu1 }
 0x38b   : > { %v782_v56 = vadd.f32 %v892_v44, %v781_v55  ;;  %v975_v57 = vpop.f32.mrb[14].mxu1 }
 0x38c   : > { %803 = vst.msk [vmem:[%s334_s26 + $0x30] sm:$0xff] %vm796_vm3, %v790_v54  ;;  %v793_v58 = vadd.f32 %v975_v57, %v892_v44  ;;  %v784_v59 = vpop.f32.mrb[15].mxu1 }
 0x38d   : > { %801 = vst.msk [vmem:[%s334_s26 + $0x20] sm:$0xff] %vm796_vm3, %v782_v56  ;;  %v785_v60 = vadd.f32 %v892_v44, %v784_v59 }
 0x38e   : > { %804 = vst.msk [vmem:[%s334_s26 + $0x38] sm:$0xff] %vm796_vm3, %v793_v58 }
 0x38f   : > { %802 = vst.msk [vmem:[%s334_s26 + $0x28] sm:$0xff] %vm796_vm3, %v785_v60 }
 0x390 PF: > { %s19_s30 = sadd.s32 1, %s999_s30  }
 0x391   : > { %p16_p4 = scmp.ge.s32.totalorder %s19_s30, 6  }
 0x393   :  { %18 = sbr.rel (!%p16_p4) target bundleno = 1 (0x1), region = 86 }

</bundles_post_ra>
